<compile_context>
chip_gen: v7x
topology: tpu7x:2x2x1
jax: 0.10.0
libtpu: 0.0.40
codegen_flags: <defaults>
</compile_context>

<pallas_src>
import jax
import jax.numpy as jnp
from jax.experimental import pallas as pl
from jax.experimental.pallas import tpu as pltpu


def _composition_kernel(x0_ref, wi_ref, wl_ref, const_ref, out_ref):
    D = out_ref.shape[1]
    D2 = 2 * D

    # Pre-folded constants (packed once on the host):
    #   row 0        : gb    = h0 @ Wh + b_ih + b_hh, gate-permuted, both dirs (1, 8D)
    #   row 1        : scale = [0.5]*6D + [1.0]*2D   (pre & post tanh scale)
    #   row 2        : shift = [0.5]*6D + [0.0]*2D   (post tanh shift)
    #   row 3 [:2D]  : c0    = [c0_f | c0_r]
    #   row 4 [:D]   : b_l
    gb = const_ref[0:1, :]
    scale = const_ref[1:2, :]
    shift = const_ref[2:3, :]
    c0 = const_ref[3:4, 0:D2]
    bl = const_ref[4:5, 0:D]

    # Input-side gate pre-activations for BOTH directions in one MXU push.
    gates = jnp.dot(x0_ref[...], wi_ref[...],
                    preferred_element_type=jnp.float32) + gb        # (TB, 8D) f32

    # One full-width EUP slab: sigmoid(x) = 0.5*tanh(0.5*x)+0.5 on the first 6D
    # lanes (i, f, o of both directions), plain tanh on the last 2D lanes (g of
    # both directions).  Scale/shift ride the (slack) VALU.
    act = jnp.tanh(gates * scale) * scale + shift                    # (TB, 8D)

    i_all = act[:, 0:D2]             # [i_f | i_r]
    f_all = act[:, D2:2 * D2]        # [f_f | f_r]
    o_all = act[:, 2 * D2:3 * D2]    # [o_f | o_r]
    g_all = act[:, 3 * D2:4 * D2]    # [g_f | g_r]

    c_new = f_all * c0 + i_all * g_all                               # (TB, 2D)
    h_all = o_all * jnp.tanh(c_new)                                  # (TB, 2D) == [h_f | h_r]

    # Linear(2D -> D) + Tanh — h_all is already in [fwd | rev] lane order, so a
    # single (TB,2D)x(2D,D) matmul suffices.
    out_ref[...] = jnp.tanh(
        jnp.dot(h_all.astype(wl_ref.dtype), wl_ref[...],
                preferred_element_type=jnp.float32) + bl)


def pack_params(params, *, mxu_dtype=jnp.float32):
    """One-time packing of the module parameters into the kernel layout.

    Call ONCE at parameter-build time and reuse the result; all concats,
    permutations and the batch-invariant h0 @ Wh fold happen here, not in the
    per-call hot path.
    """
    D = params["lstm_dim"]
    hi = jax.lax.Precision.HIGHEST

    def split_gates(w):  # columns in PyTorch order [i | f | g | o], each width D
        return w[:, 0:D], w[:, D:2 * D], w[:, 2 * D:3 * D], w[:, 3 * D:4 * D]

    # Fold the batch-invariant recurrent contribution into per-gate offsets.
    gb_f = jnp.dot(params["h0f"], params["wh_f"], precision=hi) + params["b_f"]
    gb_r = jnp.dot(params["h0r"], params["wh_r"], precision=hi) + params["b_r"]

    i_f, f_f, g_f, o_f = split_gates(params["wi_f"])
    i_r, f_r, g_r, o_r = split_gates(params["wi_r"])
    wi_cat = jnp.concatenate([i_f, i_r, f_f, f_r, o_f, o_r, g_f, g_r], axis=1)  # (D, 8D)

    bi_f, bf_f, bg_f, bo_f = split_gates(gb_f)
    bi_r, bf_r, bg_r, bo_r = split_gates(gb_r)
    gb = jnp.concatenate([bi_f, bi_r, bf_f, bf_r, bo_f, bo_r, bg_f, bg_r], axis=1)  # (1, 8D)

    scale = jnp.concatenate([jnp.full((1, 6 * D), 0.5, jnp.float32),
                             jnp.ones((1, 2 * D), jnp.float32)], axis=1)
    shift = jnp.concatenate([jnp.full((1, 6 * D), 0.5, jnp.float32),
                             jnp.zeros((1, 2 * D), jnp.float32)], axis=1)

    c0_all = jnp.concatenate([params["c0f"], params["c0r"]], axis=1)  # (1, 2D)

    consts = jnp.zeros((5, 8 * D), jnp.float32)
    consts = consts.at[0:1, :].set(gb)
    consts = consts.at[1:2, :].set(scale)
    consts = consts.at[2:3, :].set(shift)
    consts = consts.at[3:4, 0:2 * D].set(c0_all)
    consts = consts.at[4:5, 0:D].set(params["bl"])

    return dict(
        D=D,
        mxu_dtype=jnp.dtype(mxu_dtype),
        wi=wi_cat.astype(mxu_dtype),          # (D, 8D)  MXU operand
        wl=params["wl"].astype(mxu_dtype),    # (2D, D)  MXU operand, rows [fwd; rev]
        consts=consts,                        # (5, 8D)  f32 pointwise constants
    )


def compositional_nn_batch(nt_batch, packed, *, block_b=256):
    """Run B independent compositions in one pallas_call.

    nt_batch: (B, D) — one `nt_element` row per composition (the only input
    element that reaches the output of the original forward).
    packed: output of pack_params (built once, outside the hot path).
    """
    D = packed["D"]
    B = nt_batch.shape[0]

    # Sublane alignment: 8 for f32 operands, 16 for bf16 (packed sublanes).
    align = 8 if packed["mxu_dtype"].itemsize >= 4 else 16

    def rnd(n):
        return ((n + align - 1) // align) * align

    # Large tiles amortize the ~0.35 us/grid-step pipeline overhead, but keep
    # >=2 "parallel" grid steps when possible so v7x's 2 TensorCores both work.
    block_b = rnd(block_b)
    if B > align:
        block_b = min(block_b, rnd(pl.cdiv(B, 2)))
    block_b = max(align, min(block_b, rnd(B)))

    B_pad = pl.cdiv(B, block_b) * block_b
    x = nt_batch.astype(packed["mxu_dtype"])
    if B_pad != B:
        x = jnp.pad(x, ((0, B_pad - B), (0, 0)))
    grid = (B_pad // block_b,)

    def const(arr):
        return pl.BlockSpec(arr.shape, lambda i: (0,) * arr.ndim)

    out = pl.pallas_call(
        _composition_kernel,
        grid=grid,
        in_specs=[
            pl.BlockSpec((block_b, D), lambda i: (i, 0)),   # nt_element tile
            const(packed["wi"]),                             # gate-permuted input weights
            const(packed["wl"]),                             # projection weights
            const(packed["consts"]),                         # consolidated constants
        ],
        out_specs=pl.BlockSpec((block_b, D), lambda i: (i, 0)),
        out_shape=jax.ShapeDtypeStruct((B_pad, D), jnp.float32),
        compiler_params=pltpu.CompilerParams(
            dimension_semantics=("parallel",)),
    )(x, packed["wi"], packed["wl"], packed["consts"])
    return out[:B]


def compositional_nn(x_list, packed):
    """Mirror of CompositionalNN.forward: x_list is a python list of (1, D)
    embeddings in *reversed* order.  Because the reference selects
    lstm(...)[0][0] (the first output timestep), only x_list[-1] influences the
    result; the rest of the list is numerically dead work and is skipped."""
    nt_element = x_list[-1]                       # (1, D)
    return compositional_nn_batch(nt_element, packed)


def _ref_compositional(x_list, params):
    """Pure-JAX port of the original PyTorch forward, including the full
    (numerically dead) recurrence, used to validate the optimized kernel."""
    D = params["lstm_dim"]
    hi = jax.lax.Precision.HIGHEST
    nt = x_list[-1]
    rev_rest = list(x_list[:-1])
    fwd_in = jnp.concatenate([nt] + rev_rest[::-1], axis=0)   # (T, D)
    rev_in = jnp.concatenate([nt] + rev_rest, axis=0)         # (T, D)

    def run(xs, wi, wh, b, h0, c0):
        def step(carry, x_t):
            h, c = carry
            g = (jnp.dot(x_t[None, :], wi, precision=hi)
                 + jnp.dot(h, wh, precision=hi) + b)
            i = jax.nn.sigmoid(g[:, 0:D])
            f = jax.nn.sigmoid(g[:, D:2 * D])
            gg = jnp.tanh(g[:, 2 * D:3 * D])
            o = jax.nn.sigmoid(g[:, 3 * D:4 * D])
            c = f * c + i * gg
            h = o * jnp.tanh(c)
            return (h, c), h

        _, hs = jax.lax.scan(step, (h0, c0), xs)
        return hs[0]                               # == lstm(...)[0][0]

    h_f = run(fwd_in, params["wi_f"], params["wh_f"], params["b_f"],
              params["h0f"], params["c0f"])
    h_r = run(rev_in, params["wi_r"], params["wh_r"], params["b_r"],
              params["h0r"], params["c0r"])
    comb = jnp.concatenate([h_f, h_r], axis=1)
    return jnp.tanh(jnp.dot(comb, params["wl"], precision=hi) + params["bl"])


def init_params(key, lstm_dim):
    D = lstm_dim
    keys = jax.random.split(key, 16)

    def u(k, shape, bound):
        return jax.random.uniform(k, shape, jnp.float32, -bound, bound)

    k_lstm = 1.0 / float(jnp.sqrt(jnp.float32(D)))
    k_lin = 1.0 / float(jnp.sqrt(jnp.float32(2 * D)))
    k_xav = float(jnp.sqrt(jnp.float32(3.0 / D)))  # xavier_uniform for (1,1,D)

    params = dict(lstm_dim=D)
    # nn.LSTM(D, D, 1): weight_ih (4D, D), weight_hh (4D, D), bias_ih/bias_hh (4D,)
    params["wi_f"] = u(keys[0], (4 * D, D), k_lstm).T                      # (D, 4D)
    params["wh_f"] = u(keys[1], (4 * D, D), k_lstm).T                      # (D, 4D)
    params["b_f"] = (u(keys[2], (4 * D,), k_lstm)
                     + u(keys[3], (4 * D,), k_lstm)).reshape(1, 4 * D)
    params["wi_r"] = u(keys[4], (4 * D, D), k_lstm).T
    params["wh_r"] = u(keys[5], (4 * D, D), k_lstm).T
    params["b_r"] = (u(keys[6], (4 * D,), k_lstm)
                     + u(keys[7], (4 * D,), k_lstm)).reshape(1, 4 * D)
    # nn.Linear(2D, D): weight (D, 2D), bias (D,)
    params["wl"] = u(keys[8], (D, 2 * D), k_lin).T                         # (2D, D)
    params["bl"] = u(keys[9], (D,), k_lin).reshape(1, D)
    # TODO(synk): PyTorch's forward() draws fresh xaviervar (h0, c0) every call;
    # here they are fixed parameters drawn once at init.
    params["h0f"] = u(keys[10], (1, D), k_xav)
    params["c0f"] = u(keys[11], (1, D), k_xav)
    params["h0r"] = u(keys[12], (1, D), k_xav)
    params["c0r"] = u(keys[13], (1, D), k_xav)
    return params


if __name__ == "__main__":
    key = jax.random.PRNGKey(0)
    lstm_dim = 32
    seq_len = 6  # number of stack elements passed to the composition function

    pkey, xkey, bkey = jax.random.split(key, 3)
    params = init_params(pkey, lstm_dim)
    x_elems = [jax.random.normal(k, (1, lstm_dim), jnp.float32)
               for k in jax.random.split(xkey, seq_len)]

    # Pack ONCE (outside the hot path): f32 MXU operands for exact validation,
    # bf16 MXU operands for the throughput path (pointwise math stays f32).
    packed_f32 = pack_params(params, mxu_dtype=jnp.float32)
    packed_bf16 = pack_params(params, mxu_dtype=jnp.bfloat16)

    # Single composition (module-faithful API).
    out = compositional_nn(x_elems, packed_f32)
    jax.block_until_ready(out)
    assert out.shape == (1, lstm_dim) and out.dtype == jnp.float32

    # Validate against a full-recurrence pure-JAX reference of the original forward.
    ref = _ref_compositional(x_elems, params)
    assert jnp.allclose(out, ref, atol=5e-4, rtol=5e-4), (out, ref)

    # Batched throughput path: 512 independent compositions, 2 parallel tiles
    # of 256 rows each (both v7x TensorCores busy; free on v5e/v6e).
    nt_batch = jax.random.normal(bkey, (512, lstm_dim), jnp.float32)
    out_f32 = compositional_nn_batch(nt_batch, packed_f32, block_b=256)
    out_b16 = compositional_nn_batch(nt_batch, packed_bf16, block_b=256)
    jax.block_until_ready((out_f32, out_b16))
    assert out_f32.shape == (512, lstm_dim)
    # bf16 MXU operands, f32 accumulation/pointwise: loose tolerance vs f32 path.
    assert jnp.allclose(out_b16, out_f32, atol=2e-2, rtol=2e-2)

    # Batched result must match the single-composition path.
    single0 = compositional_nn([nt_batch[0:1]], packed_f32)
    assert jnp.allclose(out_f32[0:1], single0, atol=1e-5), (out_f32[0:1], single0)

    print("KERNEL_OK")
</pallas_src>

<mosaic_0001>
module attributes {stable_mosaic.version = 11 : i64} {
  func.func @_composition_kernel(%arg0: i32, %arg1: memref<8x32xf32, #tpu.memory_space<vmem>>, %arg2: memref<32x256xf32, #tpu.memory_space<vmem>>, %arg3: memref<64x32xf32, #tpu.memory_space<vmem>>, %arg4: memref<5x256xf32, #tpu.memory_space<vmem>>, %arg5: memref<8x32xf32, #tpu.memory_space<vmem>>) attributes {dimension_semantics = [#tpu.dimension_semantics<parallel>], iteration_bounds = array<i64: 1>, scalar_prefetch = 0 : i64, scratch_operands = 0 : i64, tpu.core_type = #tpu.core_type<tc>, window_params = [{transform_indices = @transform_0, window_bounds = array<i64: 8, 32>}, {pipeline_mode = #tpu.pipeline_mode<synchronous>, transform_indices = @transform_1, window_bounds = array<i64: 32, 256>}, {pipeline_mode = #tpu.pipeline_mode<synchronous>, transform_indices = @transform_2, window_bounds = array<i64: 64, 32>}, {pipeline_mode = #tpu.pipeline_mode<synchronous>, transform_indices = @transform_3, window_bounds = array<i64: 5, 256>}, {transform_indices = @transform_4, window_bounds = array<i64: 8, 32>}]} {
    %c0 = arith.constant 0 : index
    %c0_0 = arith.constant 0 : index
    %0 = vector.load %arg4[%c0, %c0_0] : memref<5x256xf32, #tpu.memory_space<vmem>>, vector<1x256xf32>
    %c1 = arith.constant 1 : index
    %c0_1 = arith.constant 0 : index
    %1 = vector.load %arg4[%c1, %c0_1] : memref<5x256xf32, #tpu.memory_space<vmem>>, vector<1x256xf32>
    %c2 = arith.constant 2 : index
    %c0_2 = arith.constant 0 : index
    %2 = vector.load %arg4[%c2, %c0_2] : memref<5x256xf32, #tpu.memory_space<vmem>>, vector<1x256xf32>
    %c3 = arith.constant 3 : index
    %c0_3 = arith.constant 0 : index
    %3 = vector.load %arg4[%c3, %c0_3] : memref<5x256xf32, #tpu.memory_space<vmem>>, vector<1x64xf32>
    %c4 = arith.constant 4 : index
    %c0_4 = arith.constant 0 : index
    %4 = vector.load %arg4[%c4, %c0_4] : memref<5x256xf32, #tpu.memory_space<vmem>>, vector<1x32xf32>
    %c0_5 = arith.constant 0 : index
    %c0_6 = arith.constant 0 : index
    %5 = vector.load %arg1[%c0_5, %c0_6] : memref<8x32xf32, #tpu.memory_space<vmem>>, vector<8x32xf32>
    %c0_7 = arith.constant 0 : index
    %c0_8 = arith.constant 0 : index
    %6 = vector.load %arg2[%c0_7, %c0_8] : memref<32x256xf32, #tpu.memory_space<vmem>>, vector<32x256xf32>
    %cst = arith.constant dense<0.000000e+00> : vector<8x256xf32>
    %7 = tpu.matmul %5, %6, %cst {dimension_numbers = #tpu.dot_dimension_numbers<[1], [0], [0], [1], [0, 0, 1, 1], [], []>} : vector<8x32xf32>, vector<32x256xf32>, vector<8x256xf32> -> vector<8x256xf32>
    %8 = vector.broadcast %0 : vector<1x256xf32> to vector<8x256xf32>
    %9 = arith.addf %7, %8 : vector<8x256xf32>
    %10 = vector.broadcast %1 : vector<1x256xf32> to vector<8x256xf32>
    %11 = arith.mulf %9, %10 : vector<8x256xf32>
    %12 = math.tanh %11 : vector<8x256xf32>
    %13 = vector.broadcast %1 : vector<1x256xf32> to vector<8x256xf32>
    %14 = arith.mulf %12, %13 : vector<8x256xf32>
    %15 = vector.broadcast %2 : vector<1x256xf32> to vector<8x256xf32>
    %16 = arith.addf %14, %15 : vector<8x256xf32>
    %17 = vector.extract_strided_slice %16 {offsets = [0, 0], sizes = [8, 64], strides = [1, 1]} : vector<8x256xf32> to vector<8x64xf32>
    %18 = vector.extract_strided_slice %16 {offsets = [0, 64], sizes = [8, 64], strides = [1, 1]} : vector<8x256xf32> to vector<8x64xf32>
    %19 = vector.extract_strided_slice %16 {offsets = [0, 128], sizes = [8, 64], strides = [1, 1]} : vector<8x256xf32> to vector<8x64xf32>
    %20 = vector.extract_strided_slice %16 {offsets = [0, 192], sizes = [8, 64], strides = [1, 1]} : vector<8x256xf32> to vector<8x64xf32>
    %21 = vector.broadcast %3 : vector<1x64xf32> to vector<8x64xf32>
    %22 = arith.mulf %18, %21 : vector<8x64xf32>
    %23 = arith.mulf %17, %20 : vector<8x64xf32>
    %24 = arith.addf %22, %23 : vector<8x64xf32>
    %25 = math.tanh %24 : vector<8x64xf32>
    %26 = arith.mulf %19, %25 : vector<8x64xf32>
    %c0_9 = arith.constant 0 : index
    %c0_10 = arith.constant 0 : index
    %27 = vector.load %arg3[%c0_9, %c0_10] : memref<64x32xf32, #tpu.memory_space<vmem>>, vector<64x32xf32>
    %cst_11 = arith.constant dense<0.000000e+00> : vector<8x32xf32>
    %28 = tpu.matmul %26, %27, %cst_11 {dimension_numbers = #tpu.dot_dimension_numbers<[1], [0], [0], [1], [0, 0, 1, 1], [], []>} : vector<8x64xf32>, vector<64x32xf32>, vector<8x32xf32> -> vector<8x32xf32>
    %29 = vector.broadcast %4 : vector<1x32xf32> to vector<8x32xf32>
    %30 = arith.addf %28, %29 : vector<8x32xf32>
    %31 = math.tanh %30 : vector<8x32xf32>
    %c0_12 = arith.constant 0 : index
    %c0_13 = arith.constant 0 : index
    %32 = vector.load %arg5[%c0_12, %c0_13] : memref<8x32xf32, #tpu.memory_space<vmem>>, vector<8x32xf32>
    tpu.vector_store %arg5[%c0_12, %c0_13], %31 {strides = array<i32>} : memref<8x32xf32, #tpu.memory_space<vmem>>, vector<8x32xf32>,
    return
  }
  func.func @transform_0(%arg0: i32) -> (i32, i32) {
    %c0_i32 = arith.constant 0 : i32
    %c0_i32_0 = arith.constant 0 : i32
    return %arg0, %c0_i32 : i32, i32
  }
  func.func @transform_1(%arg0: i32) -> (i32, i32) {
    %c0_i32 = arith.constant 0 : i32
    %c0_i32_0 = arith.constant 0 : i32
    %c0_i32_1 = arith.constant 0 : i32
    return %c0_i32, %c0_i32_0 : i32, i32
  }
  func.func @transform_2(%arg0: i32) -> (i32, i32) {
    %c0_i32 = arith.constant 0 : i32
    %c0_i32_0 = arith.constant 0 : i32
    %c0_i32_1 = arith.constant 0 : i32
    return %c0_i32, %c0_i32_0 : i32, i32
  }
  func.func @transform_3(%arg0: i32) -> (i32, i32) {
    %c0_i32 = arith.constant 0 : i32
    %c0_i32_0 = arith.constant 0 : i32
    %c0_i32_1 = arith.constant 0 : i32
    return %c0_i32, %c0_i32_0 : i32, i32
  }
  func.func @transform_4(%arg0: i32) -> (i32, i32) {
    %c0_i32 = arith.constant 0 : i32
    %c0_i32_0 = arith.constant 0 : i32
    return %arg0, %c0_i32 : i32, i32
  }
}

</mosaic_0001>

<bundles_post_ra>
// kernel: tpu_custom_call.1
= control target key start
LH: loop header
LB: loop body
LE: loop exit
PB: predicated region body
PF: predicated region fallthrough
CT: control target
= control target key end

     0   :  { %v358_v7 = vmov 0.0   ;;  %s474_s0 = inlined_call_operand.vmem [shape: f32[8,32], index: 0, kind: input, shape index: {}]   ;;  %s475_s1 = inlined_call_operand.vmem [shape: f32[32,256], index: 1, kind: input, shape index: {}]   ;;  %s476_s2 = inlined_call_operand.vmem [shape: f32[64,32], index: 2, kind: input, shape index: {}]   ;;  %s477_s3 = inlined_call_operand.vmem [shape: f32[5,256], index: 3, kind: input, shape index: {}]   ;;  %s478_s4 = inlined_call_operand.hbm [shape: f32[8,32], index: 4, kind: output, shape index: {}]  }
   0x1   :  { %v27_v0 = vld [vmem:[%s475_s1 + $0x8] sm:$0xff]  ;;  %v29_v1 = vld [vmem:[%s475_s1 + $0x18] sm:$0xff]  ;;  %v26_v2 = vld [vmem:[%s475_s1] sm:$0xff]  ;;  %113 = vmatprep.mubr.f32.mxu0 %v358_v7 }
   0x2   :  { %v301_v3 = vpack.c.bf16 %v29_v1, %v27_v0  ;;  %v28_v4 = vld [vmem:[%s475_s1 + $0x10] sm:$0xff]  ;;  %v31_v5 = vld [vmem:[%s475_s1 + $0x28] sm:$0xff]  ;;  %v33_v6 = vld [vmem:[%s475_s1 + $0x38] sm:$0xff] }
   0x3   :  { %v303_v8 = vpack.c.bf16 %v28_v4, %v26_v2  ;;  %v305_v9 = vpack.c.bf16 %v33_v6, %v31_v5  ;;  %v30_v10 = vld [vmem:[%s475_s1 + $0x20] sm:$0xff]  ;;  %v32_v11 = vld [vmem:[%s475_s1 + $0x30] sm:$0xff] }
   0x4   :  { %302 = vmatprep.subr.bf16.mxu0 %v301_v3  ;;  %v307_v12 = vpack.c.bf16 %v32_v11, %v30_v10 }
   0x5   :  { %304 = vmatpush1.bf16.msra.mxu0 %v303_v8 }
   0x6   :  { %9 = vsyncpa [#allocation3], 0  ;;  %306 = vmatprep.subr.bf16.mxu0 %v305_v9  ;;  %v25_v13 = vld [vmem:[%s474_s0] sm:$0xff]  ;;  %vm45_vm0 = vcmask 261120   ;;  %v35_v14 = vlaneseq  ;;  %s359_s11 = smov 64   ;;  %v172_v43 = vld [vmem:[%s476_s2 + $0x8] sm:$0xff] }
   0x7   :  { %v18_v17 = vld [vmem:[%s477_s3] ss:$8 sm:$0x3]  ;;  %v269_v19 = vld [vmem:[%s477_s3 + $0x1] ss:$8 sm:$0x3] }
   0x8   :  { %v36_v15 = vshrl.u32 %v35_v14, 7  ;;  %v270_v30 = vld [vmem:[%s477_s3 + $0x2] ss:$8 sm:$0x3]  ;;  %v23_v39 = vld [vmem:[%s477_s3 + $0x3] ss:$0 sm:$0xff] }
   0x9   :  { %308 = vmatpush1.bf16.msra.mxu0 %v307_v12  ;;  %v171_v42 = vld [vmem:[%s476_s2] sm:$0xff]  ;;  %v173_v44 = vld [vmem:[%s476_s2 + $0x10] sm:$0xff]  ;;  %v360_v45 = vmov 0.0|0.0   ;;  %v174_v47 = vld [vmem:[%s476_s2 + $0x18] sm:$0xff]  ;;  %vm361_vm1 = vmmov 0   ;;  %vm179_vm2 = vcmask 523264  }
   0xa   :  { %v37_v16 = vsub.s32 0, %v36_v15  ;;  %v41_v18 = vsub.s32 1, %v36_v15  ;;  %309 = vmatprep.subr.bf16.mxu1 %v360_v45  ;;  %v310_v46 = vpack.c.bf16 %v172_v43, %v171_v42  ;;  %v313_v48 = vpack.c.bf16 %v174_v47, %v173_v44  ;;  %v175_v49 = vld [vmem:[%s476_s2 + $0x20] sm:$0xff]  ;;  %v176_v50 = vld [vmem:[%s476_s2 + $0x28] sm:$0xff]  ;;  %v177_v52 = vld [vmem:[%s476_s2 + $0x30] sm:$0xff]  ;;  %298 = vmatprep.mubr.msk.f32.mxu1 %vm361_vm1, %v358_v7  ;;  %s362_s5 = smov [#allocation2]  }
   0xb   :  { %v316_v51 = vpack.c.bf16 %v176_v50, %v175_v49  ;;  %v178_v53 = vld [vmem:[%s476_s2 + $0x38] sm:$0xff]  ;;  %v24_v62 = vld [vmem:[%s477_s3 + $0x4] ss:$0 sm:$0xff]  ;;  %s261_s6 = sshll.u32 %s362_s5, 4  ;;  %s262_s6 = int_to_ptr.vmem [resolvable:$true] %s261_s6 }
   0xc   :  { %271 = vmatmul.mubr.msk.f32.vlgmr.msra.gmra.mrb[0].mxu0 %vm45_vm0, %v25_v13  ;;  %v38_v20 = vrot.slane %v18_v17, %v37_v16  ;;  %v42_v21 = vrot.slane %v18_v17, %v41_v18  ;;  %v124_v22 = vrot.slane %v269_v19, %v37_v16  ;;  %v128_v24 = vrot.slane %v269_v19, %v41_v18  ;;  %s334_s7 = scalar_lea.vmem %s262_s6, 128  ;;  %p339_p1 = scmp.lt.s32.totalorder %s262_s6, %s262_s6 }
   0xd   :  { %v141_v31 = vrot.slane %v270_v30, %v37_v16  ;;  %v145_v33 = vrot.slane %v270_v30, %v41_v18  ;;  %311 = vmatpush3.bf16.msra.mxu1 %v310_v46  ;;  %v319_v54 = vpack.c.bf16 %v178_v53, %v177_v52  ;;  %p335_p0 = scmp.ne.s32.totalorder %s262_s6, %s334_s7  ;;  %p340_p2 = scmp.lt.s32.totalorder %s334_s7, %s334_s7 }
   0xe   :  { %312 = vmatprep.subr.bf16.mxu1 %v360_v45 }
   0xf   :  { %p341_p3 = por %p340_p2, %p339_p1 }
  0x11   :  { %314 = vmatpush3.bf16.msra.mxu1 %v313_v48  ;;  %p342_p4 = pnand %p341_p3, %p335_p0 }
  0x12   :  { %315 = vmatprep.subr.bf16.mxu1 %v360_v45 }
  0x15   :  { %317 = vmatpush3.bf16.msra.mxu1 %v316_v51 }
  0x16   :  { %318 = vmatprep.subr.bf16.mxu1 %v360_v45 }
  0x19   :  { %320 = vmatpush3.bf16.msra.mxu1 %v319_v54 }
  0xdf   :  { %v115_v23 = vpop.f32.mrb[0].mxu0 }
  0xe0   :  { %v116_v25 = vadd.f32 %v115_v23, %v38_v20  ;;  %v117_v26 = vpop.f32.mrb[1].mxu0 }
  0xe1   :  { %v118_v27 = vadd.f32 %v117_v26, %v42_v21 }
  0xe2   :  { %v131_v28 = vmul.f32 %v124_v22, %v116_v25 }
  0xe3   :  { %v132_v29 = vmul.f32 %v128_v24, %v118_v27 }
  0xe4   :  { %326 = vtanh.f32 %v131_v28 }
  0xe5   :  { %328 = vtanh.f32 %v132_v29 }
  0xee   :  { %v327_v32 = vpop.eup %326 }
  0xef   :  { %v329_v34 = vpop.eup %328  ;;  %v135_v35 = vmul.f32 %v327_v32, %v124_v22 }
  0xf0   :  { %v136_v36 = vmul.f32 %v329_v34, %v128_v24 }
  0xf1   :  { %v148_v37 = vadd.f32 %v141_v31, %v135_v35 }
  0xf2   :  { %v149_v38 = vadd.f32 %v145_v33, %v136_v36 }
  0xf4   :  { %156 = vrot.lane.b32.xlu0 %v149_v38, %s359_s11 }
  0xf8   :  { %151 = vrot.lane.b32.xlu0 %v23_v39, %s359_s11 }
 0x166   :  { %v157_v40 = vpop.permute.xlu0 %156 }
 0x167   :  { %v159_v41 = vmul.f32 %v157_v40, %v148_v37 }
 0x169   :  { %161 = vrot.lane.b32.xlu1 %v159_v41, %s359_s11 }
 0x16a   :  { %v152_v55 = vpop.permute.xlu0 %151 }
 0x16b   :  { %v154_v56 = vmul.f32 %v152_v55, %v148_v37 }
 0x1db   :  { %v162_v57 = vpop.permute.xlu1 %161 }
 0x1dc   :  { %v164_v58 = vadd.f32 %v162_v57, %v154_v56 }
 0x1de   :  { %330 = vtanh.f32 %v164_v58 }
 0x1e8   :  { %v331_v59 = vpop.eup %330 }
 0x1e9   :  { %167 = vrot.lane.b32.xlu1 %v331_v59, %s359_s11 }
 0x25b   :  { %v168_v60 = vpop.permute.xlu1 %167 }
 0x25c   :  { %v170_v61 = vmul.f32 %v168_v60, %v149_v38 }
 0x25e   :  { %299 = vmatmul.mubr.msk.f32.vlgmr.msra.gmra.mrb[0].mxu1 %vm179_vm2, %v170_v61 }
 0x331   :  { %v249_v63 = vpop.f32.mrb[0].mxu1 }
 0x332   :  { %v250_v0 = vadd.f32 %v249_v63, %v24_v62  ;;  %v300_v1 = vpop.f32.mrb[1].mxu1 }
 0x334   :  { %332 = vtanh.f32 %v250_v0 }
 0x33e   :  { %v333_v2 = vpop.eup %332 }
 0x33f   :  { %254 = vst.msk [vmem:[#allocation2] sm:$0xff] %vm45_vm0, %v333_v2 }
 0x340   :  { %345 = shalt.err (!%p342_p4)
}
 0x341   :  { %s346_s3 = scalar_lea.hbm %s478_s4, 128 }
 0x342   :  { %p347_p5 = scmp.ne.s32.totalorder %s478_s4, %s346_s3  ;;  %p350_p6 = scmp.lt.u32.totalorder %s346_s3, %s478_s4 }
 0x344   :  { %p352_p7 = pnand %p350_p6, %p347_p5 }
 0x346   :  { %355 = shalt.err (!%p352_p7)
}
 0x347   :  { %264 = dma.vmem_to_hbm [thread:$0]  %s262_s6, 128, %s478_s4, [#allocation3]  }
 0x348   :  { %356 = dma.done.wait [#allocation3], 128  }
 0x349   :  { %357 = vsyncadd [#allocation3], 4294967168 }
 0x34a   :  { %268 = vsyncpa [#allocation3], 1 }

</bundles_post_ra>
